<compile_context>
chip_gen: v6e
topology: v6e:2x2x1
jax: 0.10.0
libtpu: 0.0.40
codegen_flags: <defaults>
</compile_context>

<pallas_src>
import functools

import jax
import jax.numpy as jnp
from jax.experimental import pallas as pl
from jax.experimental.pallas import tpu as pltpu

SUBLANE = 8
LANE = 128


def _round_up(x, m):
    return ((x + m - 1) // m) * m


def _num_tensorcores():
    """Best-effort TensorCore count of the local device (v7x has 2, v5e/v6e 1)."""
    try:
        return max(1, int(getattr(jax.devices()[0], "num_cores", 1)))
    except Exception:
        return 1


def mlp_kernel(x_ref, w_ref, b_ref, o_ref, *, num_inputs):
    """Fused 3-layer MLP (Linear-ReLU-Linear-ReLU-Linear) on one batch tile.

    x_ref : (tile, num_inputs)  activations, feature dim unpadded
    w_ref : (3, D, D)           zero-padded weights, VMEM-resident
    b_ref : (3, 1, D)           zero-padded biases,  VMEM-resident
    o_ref : (tile, D)           lane-dense padded logits (cols >= num_outputs are 0)
    """
    x = x_ref[...]
    # Static sublane slice of the first weight matrix: only the first
    # `num_inputs` rows carry real data (the rest are zero padding anyway).
    w0 = w_ref[0, :num_inputs, :]
    h = jnp.dot(x, w0, preferred_element_type=jnp.float32) + b_ref[0]
    h = jnp.maximum(h, 0.0)  # ReLU (padded hidden cols stay exactly 0)
    h = jnp.dot(h, w_ref[1], preferred_element_type=jnp.float32) + b_ref[1]
    h = jnp.maximum(h, 0.0)  # ReLU
    o_ref[...] = jnp.dot(h, w_ref[2], preferred_element_type=jnp.float32) + b_ref[2]


def _choose_batch_tile(b_rows, *, num_cores, max_tile=2048):
    """Pick the M tile.

    Single grid step whenever it fits (v5e/v6e have 1 TC so extra steps only
    add ~0.35 us/step of pipeline overhead).  Split into >=2 steps only when
    the chip has >=2 TensorCores (v7x) AND the batch is big enough that each
    core gets work that amortizes the split.
    """
    b8 = _round_up(max(b_rows, SUBLANE), SUBLANE)
    if num_cores >= 2 and b8 >= 4096:
        # Per-core work is several us at these sizes -> worth sharding.
        tile = min(max_tile, _round_up(pl.cdiv(b8, 2), SUBLANE))
    else:
        tile = min(max_tile, b8)
    return tile


def pack_params(params, *, lane=LANE):
    """Zero-pad all layers to a common lane-dense width D (multiple of 128) and
    pack them into two contiguous blobs.

    Call this ONCE per parameter update (outside the per-step forward path); the
    forward then reuses (w_blob, b_blob) across every rollout/forward call.
    """
    w1, b1, w2, b2, w3, b3 = params
    num_inputs, h1 = w1.shape
    h2 = w2.shape[1]
    num_outputs = w3.shape[1]
    d_pad = _round_up(max(num_inputs, h1, h2, num_outputs, lane), lane)

    def pad_w(w):
        out = jnp.zeros((d_pad, d_pad), jnp.float32)
        return out.at[: w.shape[0], : w.shape[1]].set(w.astype(jnp.float32))

    def pad_b(b):
        b = b.reshape(1, -1).astype(jnp.float32)
        out = jnp.zeros((1, d_pad), jnp.float32)
        return out.at[:, : b.shape[1]].set(b)

    w_blob = jnp.stack([pad_w(w1), pad_w(w2), pad_w(w3)])  # (3, D, D)
    b_blob = jnp.stack([pad_b(b1), pad_b(b2), pad_b(b3)])  # (3, 1, D)
    return w_blob, b_blob


@functools.partial(
    jax.jit,
    static_argnames=("num_inputs", "num_outputs", "batch_tile", "slice_logits"),
)
def quantum_pg_classical_forward(
    x, w_blob, b_blob, *, num_inputs, num_outputs,
    batch_tile=None, slice_logits=True,
):
    """logits = actor_network(x); returns (logits, []) — matches module.forward.

    x      : (B, num_inputs) f32
    w_blob : (3, D, D) f32 pre-packed weights (see pack_params)
    b_blob : (3, 1, D) f32 pre-packed biases
    """
    B = x.shape[0]
    assert x.shape[1] == num_inputs
    d_pad = w_blob.shape[-1]

    # --- VMEM guard for the whole-blob-resident weight design -------------
    # Double-buffered resident weights cost 2 * 3 * D * D * 4 bytes of VMEM.
    # At D=128 that's 384 KiB; it stops fitting the 32 MiB scoped default
    # (and v7x's 64 MiB physical VMEM) around D ~ 1.1K f32.  Beyond that,
    # switch to K/N-tiled weight BlockSpecs instead of constant index_maps.
    resident_weight_bytes = 2 * w_blob.size * 4 + 2 * b_blob.size * 4
    assert resident_weight_bytes < 24 * 1024 * 1024, (
        "hidden sizes too large for VMEM-resident weight blobs; tile K/N")

    if batch_tile is None:
        batch_tile = _choose_batch_tile(B, num_cores=_num_tensorcores())
    batch_tile = max(SUBLANE, (batch_tile // SUBLANE) * SUBLANE)
    b_pad = _round_up(B, batch_tile)
    grid = (b_pad // batch_tile,)

    # Pad ONLY the batch axis (feature dim stays at num_inputs — no 16x
    # inflated activation buffer in HBM).
    x = x.astype(jnp.float32)
    if b_pad != B:
        x = jnp.pad(x, ((0, b_pad - B), (0, 0)))

    flops = 2 * b_pad * d_pad * (num_inputs + 2 * d_pad)
    bytes_accessed = x.size * 4 + w_blob.size * 4 + b_blob.size * 4 + b_pad * d_pad * 4
    cost = pl.CostEstimate(flops=flops, transcendentals=0,
                           bytes_accessed=bytes_accessed)

    kernel = functools.partial(mlp_kernel, num_inputs=num_inputs)

    logits_pad = pl.pallas_call(
        kernel,
        out_shape=jax.ShapeDtypeStruct((b_pad, d_pad), jnp.float32),
        grid_spec=pl.GridSpec(
            grid=grid,
            in_specs=[
                # Last block dim == full array dim -> satisfies (8,128) rule
                # even though num_inputs < 128.
                pl.BlockSpec((batch_tile, num_inputs), lambda i: (i, 0)),
                # Constant block index -> weights/biases DMA'd once, resident.
                pl.BlockSpec((3, d_pad, d_pad), lambda i: (0, 0, 0)),
                pl.BlockSpec((3, 1, d_pad), lambda i: (0, 0, 0)),
            ],
            out_specs=pl.BlockSpec((batch_tile, d_pad), lambda i: (i, 0)),
        ),
        compiler_params=pltpu.CompilerParams(
            dimension_semantics=("parallel",),
        ),
        cost_estimate=cost,
    )(x, w_blob, b_blob)

    if slice_logits:
        logits = logits_pad[:B, :num_outputs]
    else:
        # Caller tolerates lane-padded (b_pad, D) logits (e.g. masked sampling):
        # skip the extra slice/copy launch on the latency-bound path.
        logits = logits_pad
    return logits, []


def init_linear(key, fan_in, fan_out):
    """PyTorch-style nn.Linear init: U(-1/sqrt(fan_in), 1/sqrt(fan_in))."""
    kw, kb = jax.random.split(key)
    bound = 1.0 / jnp.sqrt(jnp.float32(fan_in))
    w = jax.random.uniform(kw, (fan_in, fan_out), jnp.float32, -bound, bound)
    b = jax.random.uniform(kb, (1, fan_out), jnp.float32, -bound, bound)
    return w, b


def reference_forward(x, params):
    w1, b1, w2, b2, w3, b3 = params
    h1 = jnp.maximum(x @ w1 + b1, 0.0)
    h2 = jnp.maximum(h1 @ w2 + b2, 0.0)
    return h2 @ w3 + b3


if __name__ == "__main__":
    # Config implied by the module: Box obs with num_inputs features,
    # Discrete(num_actions) action space -> num_outputs = num_actions,
    # layer_size = [32, 32], activation = relu.  Small smoke-test shapes.
    batch = 64
    num_inputs = 8
    layer_size = (32, 32)
    num_outputs = 4

    key = jax.random.PRNGKey(0)
    kx, k1, k2, k3 = jax.random.split(key, 4)

    x = jax.random.normal(kx, (batch, num_inputs), jnp.float32)
    w1, b1 = init_linear(k1, num_inputs, layer_size[0])
    w2, b2 = init_linear(k2, layer_size[0], layer_size[1])
    w3, b3 = init_linear(k3, layer_size[1], num_outputs)
    params = (w1, b1, w2, b2, w3, b3)

    # Pack once (per parameter update), reuse for every forward.
    w_blob, b_blob = pack_params(params)
    w_blob, b_blob = jax.block_until_ready((w_blob, b_blob))

    logits, state_out = quantum_pg_classical_forward(
        x, w_blob, b_blob, num_inputs=num_inputs, num_outputs=num_outputs)
    logits = jax.block_until_ready(logits)

    ref = reference_forward(x, params)
    assert logits.shape == (batch, num_outputs)
    assert state_out == []
    # MXU may lower f32 matmuls through reduced-precision bf16 passes depending
    # on default matmul precision, so use a tolerance that covers that path.
    assert jnp.allclose(logits, ref, atol=2e-2, rtol=2e-2), (
        float(jnp.max(jnp.abs(logits - ref))))

    # Also exercise a batch that is not a multiple of 8 (batch-padding path).
    x_odd = jax.random.normal(kx, (19, num_inputs), jnp.float32)
    logits_odd, _ = quantum_pg_classical_forward(
        x_odd, w_blob, b_blob, num_inputs=num_inputs, num_outputs=num_outputs)
    logits_odd = jax.block_until_ready(logits_odd)
    assert logits_odd.shape == (19, num_outputs)
    assert jnp.allclose(logits_odd, reference_forward(x_odd, params),
                        atol=2e-2, rtol=2e-2)

    print("KERNEL_OK")
</pallas_src>

<mosaic_0001>
module attributes {stable_mosaic.version = 11 : i64} {
  func.func @mlp_kernel(%arg0: i32, %arg1: memref<64x8xf32, #tpu.memory_space<vmem>>, %arg2: memref<3x128x128xf32, #tpu.memory_space<vmem>>, %arg3: memref<3x1x128xf32, #tpu.memory_space<vmem>>, %arg4: memref<64x128xf32, #tpu.memory_space<vmem>>) attributes {dimension_semantics = [#tpu.dimension_semantics<parallel>], iteration_bounds = array<i64: 1>, scalar_prefetch = 0 : i64, scratch_operands = 0 : i64, tpu.core_type = #tpu.core_type<tc>, window_params = [{transform_indices = @transform_0, window_bounds = array<i64: 64, 8>}, {pipeline_mode = #tpu.pipeline_mode<synchronous>, transform_indices = @transform_1, window_bounds = array<i64: 3, 128, 128>}, {pipeline_mode = #tpu.pipeline_mode<synchronous>, transform_indices = @transform_2, window_bounds = array<i64: 3, 1, 128>}, {transform_indices = @transform_3, window_bounds = array<i64: 64, 128>}]} {
    %c0 = arith.constant 0 : index
    %c0_0 = arith.constant 0 : index
    %0 = vector.load %arg1[%c0, %c0_0] : memref<64x8xf32, #tpu.memory_space<vmem>>, vector<64x8xf32>
    %c0_1 = arith.constant 0 : index
    %c0_2 = arith.constant 0 : index
    %c0_3 = arith.constant 0 : index
    %1 = vector.load %arg2[%c0_1, %c0_2, %c0_3] : memref<3x128x128xf32, #tpu.memory_space<vmem>>, vector<1x8x128xf32>
    %2 = vector.shape_cast %1 : vector<1x8x128xf32> to vector<8x128xf32>
    %cst = arith.constant dense<0.000000e+00> : vector<64x128xf32>
    %3 = tpu.matmul %0, %2, %cst {dimension_numbers = #tpu.dot_dimension_numbers<[1], [0], [0], [1], [0, 0, 1, 1], [], []>} : vector<64x8xf32>, vector<8x128xf32>, vector<64x128xf32> -> vector<64x128xf32>
    %c0_4 = arith.constant 0 : index
    %c0_5 = arith.constant 0 : index
    %c0_6 = arith.constant 0 : index
    %4 = vector.load %arg3[%c0_4, %c0_5, %c0_6] : memref<3x1x128xf32, #tpu.memory_space<vmem>>, vector<1x1x128xf32>
    %5 = vector.shape_cast %4 : vector<1x1x128xf32> to vector<1x128xf32>
    %6 = vector.broadcast %5 : vector<1x128xf32> to vector<64x128xf32>
    %7 = arith.addf %3, %6 : vector<64x128xf32>
    %cst_7 = arith.constant 0.000000e+00 : f32
    %8 = vector.broadcast %cst_7 : f32 to vector<64x128xf32>
    %9 = arith.maximumf %7, %8 : vector<64x128xf32>
    %c1 = arith.constant 1 : index
    %c0_8 = arith.constant 0 : index
    %c0_9 = arith.constant 0 : index
    %10 = vector.load %arg2[%c1, %c0_8, %c0_9] : memref<3x128x128xf32, #tpu.memory_space<vmem>>, vector<1x128x128xf32>
    %11 = vector.shape_cast %10 : vector<1x128x128xf32> to vector<128x128xf32>
    %cst_10 = arith.constant dense<0.000000e+00> : vector<64x128xf32>
    %12 = tpu.matmul %9, %11, %cst_10 {dimension_numbers = #tpu.dot_dimension_numbers<[1], [0], [0], [1], [0, 0, 1, 1], [], []>} : vector<64x128xf32>, vector<128x128xf32>, vector<64x128xf32> -> vector<64x128xf32>
    %c1_11 = arith.constant 1 : index
    %c0_12 = arith.constant 0 : index
    %c0_13 = arith.constant 0 : index
    %13 = vector.load %arg3[%c1_11, %c0_12, %c0_13] : memref<3x1x128xf32, #tpu.memory_space<vmem>>, vector<1x1x128xf32>
    %14 = vector.shape_cast %13 : vector<1x1x128xf32> to vector<1x128xf32>
    %15 = vector.broadcast %14 : vector<1x128xf32> to vector<64x128xf32>
    %16 = arith.addf %12, %15 : vector<64x128xf32>
    %cst_14 = arith.constant 0.000000e+00 : f32
    %17 = vector.broadcast %cst_14 : f32 to vector<64x128xf32>
    %18 = arith.maximumf %16, %17 : vector<64x128xf32>
    %c2 = arith.constant 2 : index
    %c0_15 = arith.constant 0 : index
    %c0_16 = arith.constant 0 : index
    %19 = vector.load %arg2[%c2, %c0_15, %c0_16] : memref<3x128x128xf32, #tpu.memory_space<vmem>>, vector<1x128x128xf32>
    %20 = vector.shape_cast %19 : vector<1x128x128xf32> to vector<128x128xf32>
    %cst_17 = arith.constant dense<0.000000e+00> : vector<64x128xf32>
    %21 = tpu.matmul %18, %20, %cst_17 {dimension_numbers = #tpu.dot_dimension_numbers<[1], [0], [0], [1], [0, 0, 1, 1], [], []>} : vector<64x128xf32>, vector<128x128xf32>, vector<64x128xf32> -> vector<64x128xf32>
    %c2_18 = arith.constant 2 : index
    %c0_19 = arith.constant 0 : index
    %c0_20 = arith.constant 0 : index
    %22 = vector.load %arg3[%c2_18, %c0_19, %c0_20] : memref<3x1x128xf32, #tpu.memory_space<vmem>>, vector<1x1x128xf32>
    %23 = vector.shape_cast %22 : vector<1x1x128xf32> to vector<1x128xf32>
    %24 = vector.broadcast %23 : vector<1x128xf32> to vector<64x128xf32>
    %25 = arith.addf %21, %24 : vector<64x128xf32>
    %c0_21 = arith.constant 0 : index
    %c0_22 = arith.constant 0 : index
    %26 = vector.load %arg4[%c0_21, %c0_22] : memref<64x128xf32, #tpu.memory_space<vmem>>, vector<64x128xf32>
    tpu.vector_store %arg4[%c0_21, %c0_22], %25 {strides = array<i32>} : memref<64x128xf32, #tpu.memory_space<vmem>>, vector<64x128xf32>,
    return
  }
  func.func @transform_0(%arg0: i32) -> (i32, i32) {
    %c0_i32 = arith.constant 0 : i32
    %c0_i32_0 = arith.constant 0 : i32
    return %arg0, %c0_i32 : i32, i32
  }
  func.func @transform_1(%arg0: i32) -> (i32, i32, i32) {
    %c0_i32 = arith.constant 0 : i32
    %c0_i32_0 = arith.constant 0 : i32
    %c0_i32_1 = arith.constant 0 : i32
    %c0_i32_2 = arith.constant 0 : i32
    return %c0_i32, %c0_i32_0, %c0_i32_1 : i32, i32, i32
  }
  func.func @transform_2(%arg0: i32) -> (i32, i32, i32) {
    %c0_i32 = arith.constant 0 : i32
    %c0_i32_0 = arith.constant 0 : i32
    %c0_i32_1 = arith.constant 0 : i32
    %c0_i32_2 = arith.constant 0 : i32
    return %c0_i32, %c0_i32_0, %c0_i32_1 : i32, i32, i32
  }
  func.func @transform_3(%arg0: i32) -> (i32, i32) {
    %c0_i32 = arith.constant 0 : i32
    %c0_i32_0 = arith.constant 0 : i32
    return %arg0, %c0_i32 : i32, i32
  }
}

</mosaic_0001>

<bundles_post_ra>
// kernel: quantum_pg_classical_forward.1
= control target key start
LH: loop header
LB: loop body
LE: loop exit
PB: predicated region body
PF: predicated region fallthrough
CT: control target
= control target key end

     0   :  { %8 = vsyncpa [#allocation3], 0  ;;  %s660_s12 = smov [#allocation2]   ;;  %s751_s0 = inlined_call_operand.vmem [shape: f32[64,8], index: 0, kind: input, shape index: {}]   ;;  %s752_s1 = inlined_call_operand.hbm [shape: f32[3,128,128], index: 1, kind: input, shape index: {}]   ;;  %s753_s2 = inlined_call_operand.vmem [shape: f32[3,1,128], index: 2, kind: input, shape index: {}]   ;;  %s754_s3 = inlined_call_operand.vmem [shape: f32[64,128], index: 3, kind: output, shape index: {}]  }
   0x1   :  { %s16_s13 = sshll.u32 %s660_s12, 4  ;;  %s17_s13 = int_to_ptr.vmem [resolvable:$true] %s16_s13 }
   0x2   :  { %s646_s14 = scalar_lea.vmem %s17_s13, 6144  ;;  %p651_p1 = scmp.lt.s32.totalorder %s17_s13, %s17_s13 }
   0x3   :  { %p647_p0 = scmp.ne.s32.totalorder %s17_s13, %s646_s14  ;;  %p652_p2 = scmp.lt.s32.totalorder %s646_s14, %s646_s14 }
   0x5   :  { %p653_p3 = por %p652_p2, %p651_p1 }
   0x7   :  { %p654_p4 = pnand %p653_p3, %p647_p0 }
   0x9   :  { %657 = shalt.err (!%p654_p4)
}
   0xa   :  { %s661_s15 = smov 128   ;;  %s662_s16 = smov 8  }
   0xb   :  { %22 = dma.hbm_to_vmem [thread:$0]  %s752_s1, 6144, %s17_s13, [#allocation3], %s661_s15, %s661_s15, %s662_s16  }
   0xc   :  { %658 = dma.done.wait [#allocation3], 6144  }
   0xd   :  { %659 = vsyncadd [#allocation3], 4294961152  ;;  %vm44_vm0 = vcmask 64512   ;;  %v36_v0 = vld [vmem:[#allocation2] sm:$0xff]  ;;  %v29_v2 = vld [vmem:[%s751_s0 + $0x8] sm:$0xff] }
   0xe   :  { %v28_v1 = vld [vmem:[%s751_s0] sm:$0xff]  ;;  %533 = vmatprep.subr.mxu0 %v36_v0  ;;  %v30_v3 = vld [vmem:[%s751_s0 + $0x10] sm:$0xff]  ;;  %v198_v4 = vld [vmem:[#allocation2 + $0xf8] sm:$0xff] }
   0xf   :  { %535 = vmatprep.mubr.msk.f32.mxu0 %vm44_vm0, %v28_v1  ;;  %534 = vmatpush3.msra.mxu0 %v36_v0  ;;  %v197_v5 = vld [vmem:[#allocation2 + $0xf0] sm:$0xff]  ;;  %v31_v6 = vld [vmem:[%s751_s0 + $0x18] sm:$0xff]  ;;  %v32_v7 = vld [vmem:[%s751_s0 + $0x20] sm:$0xff] }
  0x10   :  { %536 = vmatmul.mubr.msk.f32.vlgmr.msra.gmra.mxu0 %vm44_vm0, %v29_v2  ;;  %547 = vmatprep.subr.mxu1 %v198_v4  ;;  %v196_v8 = vld [vmem:[#allocation2 + $0xe8] sm:$0xff]  ;;  %v195_v9 = vld [vmem:[#allocation2 + $0xe0] sm:$0xff]  ;;  %v34_v11 = vld [vmem:[%s751_s0 + $0x30] sm:$0xff] }
  0x11   :  { %538 = vmatprep.mubr.msk.f32.mxu0 %vm44_vm0, %v30_v3  ;;  %548 = vmatpush3.msra.mxu1 %v198_v4  ;;  %v33_v10 = vld [vmem:[%s751_s0 + $0x28] sm:$0xff]  ;;  %v194_v12 = vld [vmem:[#allocation2 + $0xd8] sm:$0xff]  ;;  %v193_v13 = vld [vmem:[#allocation2 + $0xd0] sm:$0xff] }
  0x12   :  { %549 = vmatprep.subr.mxu1 %v197_v5  ;;  %v35_v14 = vld [vmem:[%s751_s0 + $0x38] sm:$0xff]  ;;  %v192_v15 = vld [vmem:[#allocation2 + $0xc8] sm:$0xff]  ;;  %v191_v16 = vld [vmem:[#allocation2 + $0xc0] sm:$0xff] }
  0x13   :  { %550 = vmatpush3.msra.mxu1 %v197_v5  ;;  %v190_v17 = vld [vmem:[#allocation2 + $0xb8] sm:$0xff]  ;;  %v189_v18 = vld [vmem:[#allocation2 + $0xb0] sm:$0xff]  ;;  %v188_v19 = vld [vmem:[#allocation2 + $0xa8] sm:$0xff] }
  0x14   :  { %539 = vmatmul.mubr.msk.f32.gmra.mxu0 %vm44_vm0, %v31_v6  ;;  %551 = vmatprep.subr.mxu1 %v196_v8  ;;  %v187_v20 = vld [vmem:[#allocation2 + $0xa0] sm:$0xff]  ;;  %v186_v21 = vld [vmem:[#allocation2 + $0x98] sm:$0xff]  ;;  %v185_v22 = vld [vmem:[#allocation2 + $0x90] sm:$0xff] }
  0x15   :  { %541 = vmatprep.mubr.msk.f32.mxu0 %vm44_vm0, %v32_v7  ;;  %552 = vmatpush3.msra.mxu1 %v196_v8  ;;  %v184_v23 = vld [vmem:[#allocation2 + $0x88] sm:$0xff]  ;;  %v183_v24 = vld [vmem:[#allocation2 + $0x80] sm:$0xff]  ;;  %v336_v25 = vld [vmem:[#allocation2 + $0x178] sm:$0xff] }
  0x16   :  { %553 = vmatprep.subr.mxu1 %v195_v9  ;;  %v335_v26 = vld [vmem:[#allocation2 + $0x170] sm:$0xff]  ;;  %591 = vmatprep.subr.mxu0 %v336_v25  ;;  %v334_v27 = vld [vmem:[#allocation2 + $0x168] sm:$0xff]  ;;  %v333_v28 = vld [vmem:[#allocation2 + $0x160] sm:$0xff] }
  0x17   :  { %554 = vmatpush3.msra.mxu1 %v195_v9  ;;  %592 = vmatpush3.msra.mxu0 %v336_v25  ;;  %v332_v29 = vld [vmem:[#allocation2 + $0x158] sm:$0xff]  ;;  %v331_v30 = vld [vmem:[#allocation2 + $0x150] sm:$0xff]  ;;  %v330_v31 = vld [vmem:[#allocation2 + $0x148] sm:$0xff] }
  0x18   :  { %542 = vmatmul.mubr.msk.f32.gmra.mxu0 %vm44_vm0, %v33_v10  ;;  %555 = vmatprep.subr.mxu1 %v194_v12  ;;  %v329_v32 = vld [vmem:[#allocation2 + $0x140] sm:$0xff]  ;;  %v328_v33 = vld [vmem:[#allocation2 + $0x138] sm:$0xff]  ;;  %v327_v34 = vld [vmem:[#allocation2 + $0x130] sm:$0xff] }
  0x19   :  { %544 = vmatprep.mubr.msk.f32.mxu0 %vm44_vm0, %v34_v11  ;;  %556 = vmatpush3.msra.mxu1 %v194_v12  ;;  %v326_v35 = vld [vmem:[#allocation2 + $0x128] sm:$0xff]  ;;  %v325_v36 = vld [vmem:[#allocation2 + $0x120] sm:$0xff]  ;;  %v324_v62 = vld [vmem:[#allocation2 + $0x118] sm:$0xff] }
  0x1a   :  { %557 = vmatprep.subr.mxu1 %v193_v13  ;;  %593 = vmatprep.subr.mxu0 %v335_v26  ;;  %v463_v37 = vld [vmem:[%s753_s2] ss:$0 sm:$0xff]  ;;  %v323_v63 = vld [vmem:[#allocation2 + $0x110] sm:$0xff]  ;;  %v322_v0 = vld [vmem:[#allocation2 + $0x108] sm:$0xff] }
  0x1b   :  { %558 = vmatpush3.msra.mxu1 %v193_v13  ;;  %594 = vmatpush3.msra.mxu0 %v335_v26  ;;  %v321_v1 = vld [vmem:[#allocation2 + $0x100] sm:$0xff] }
  0x1c   :  { %545 = vmatmul.mubr.msk.f32.gmra.mxu0 %vm44_vm0, %v35_v14  ;;  %559 = vmatprep.subr.mxu1 %v192_v15  ;;  %v473_v2 = vld [vmem:[%s753_s2 + $0x1] ss:$0 sm:$0xff] }
  0x1d   :  { %560 = vmatpush3.msra.mxu1 %v192_v15  ;;  %595 = vmatprep.subr.mxu0 %v334_v27 }
  0x1e   :  { %561 = vmatprep.subr.mxu1 %v191_v16  ;;  %596 = vmatpush3.msra.mxu0 %v334_v27  ;;  %v475_v27 = vld [vmem:[%s753_s2 + $0x2] ss:$0 sm:$0xff] }
  0x1f   :  { %562 = vmatpush3.msra.mxu1 %v191_v16  ;;  %597 = vmatprep.subr.mxu0 %v333_v28 }
  0x20   :  { %563 = vmatprep.subr.mxu1 %v190_v17  ;;  %598 = vmatpush3.msra.mxu0 %v333_v28 }
  0x21   :  { %564 = vmatpush3.msra.mxu1 %v190_v17  ;;  %599 = vmatprep.subr.mxu0 %v332_v29 }
  0x22   :  { %565 = vmatprep.subr.mxu1 %v189_v18  ;;  %600 = vmatpush3.msra.mxu0 %v332_v29 }
  0x23   :  { %566 = vmatpush3.msra.mxu1 %v189_v18  ;;  %601 = vmatprep.subr.mxu0 %v331_v30 }
  0x24   :  { %567 = vmatprep.subr.mxu1 %v188_v19  ;;  %602 = vmatpush3.msra.mxu0 %v331_v30 }
  0x25   :  { %568 = vmatpush3.msra.mxu1 %v188_v19  ;;  %603 = vmatprep.subr.mxu0 %v330_v31 }
  0x26   :  { %569 = vmatprep.subr.mxu1 %v187_v20  ;;  %604 = vmatpush3.msra.mxu0 %v330_v31 }
  0x27   :  { %570 = vmatpush3.msra.mxu1 %v187_v20  ;;  %605 = vmatprep.subr.mxu0 %v329_v32 }
  0x28   :  { %571 = vmatprep.subr.mxu1 %v186_v21  ;;  %606 = vmatpush3.msra.mxu0 %v329_v32 }
  0x29   :  { %572 = vmatpush3.msra.mxu1 %v186_v21  ;;  %607 = vmatprep.subr.mxu0 %v328_v33 }
  0x2a   :  { %573 = vmatprep.subr.mxu1 %v185_v22  ;;  %608 = vmatpush3.msra.mxu0 %v328_v33 }
  0x2b   :  { %574 = vmatpush3.msra.mxu1 %v185_v22  ;;  %609 = vmatprep.subr.mxu0 %v327_v34 }
  0x2c   :  { %575 = vmatprep.subr.mxu1 %v184_v23  ;;  %610 = vmatpush3.msra.mxu0 %v327_v34 }
  0x2d   :  { %576 = vmatpush3.msra.mxu1 %v184_v23  ;;  %611 = vmatprep.subr.mxu0 %v326_v35 }
  0x2e   :  { %577 = vmatprep.subr.mxu1 %v183_v24  ;;  %612 = vmatpush3.msra.mxu0 %v326_v35 }
  0x2f   :  { %578 = vmatpush3.msra.mxu1 %v183_v24  ;;  %613 = vmatprep.subr.mxu0 %v325_v36 }
  0x30   :  { %614 = vmatpush3.msra.mxu0 %v325_v36 }
  0x31   :  { %615 = vmatprep.subr.mxu0 %v324_v62 }
  0x32   :  { %616 = vmatpush3.msra.mxu0 %v324_v62 }
  0x33   :  { %617 = vmatprep.subr.mxu0 %v323_v63 }
  0x34   :  { %618 = vmatpush3.msra.mxu0 %v323_v63 }
  0x35   :  { %619 = vmatprep.subr.mxu0 %v322_v0 }
  0x36   :  { %620 = vmatpush3.msra.mxu0 %v322_v0 }
  0x37   :  { %621 = vmatprep.subr.mxu0 %v321_v1 }
  0x38   :  { %622 = vmatpush3.msra.mxu0 %v321_v1 }
  0xd0   :  { %v537_v38 = vpop.f32.mrf.mxu0 }
  0xd1   :  { %v141_v39 = vadd.f32 %v537_v38, %v463_v37 }
  0xd2   :  { %v135_v40 = vpop.f32.mrf.mxu0 }
  0xd3   :  { %v136_v41 = vadd.f32 %v463_v37, %v135_v40  ;;  %v175_v44 = vmax.f32 %v141_v39, 0.0 }
  0xd4   :  { %v540_v42 = vpop.f32.mrf.mxu0 }
  0xd5   :  { %v174_v43 = vmax.f32 %v136_v41, 0.0  ;;  %v151_v45 = vadd.f32 %v540_v42, %v463_v37 }
  0xd6   :  { %v145_v46 = vpop.f32.mrf.mxu0 }
  0xd7   :  { %v146_v47 = vadd.f32 %v463_v37, %v145_v46  ;;  %579 = vmatprep.mubr.f32.mxu1 %v174_v43  ;;  %v177_v50 = vmax.f32 %v151_v45, 0.0 }
  0xd8   :  { %v543_v48 = vpop.f32.mrf.mxu0  ;;  %580 = vmatmul.mubr.f32.vlgmr.msra.gmra.mxu1 %v175_v44 }
  0xd9   :  { %v176_v49 = vmax.f32 %v146_v47, 0.0  ;;  %v161_v51 = vadd.f32 %v543_v48, %v463_v37 }
  0xda   :  { %v155_v52 = vpop.f32.mrf.mxu0 }
  0xdb   :  { %v156_v53 = vadd.f32 %v463_v37, %v155_v52  ;;  %582 = vmatprep.mubr.f32.mxu1 %v176_v49  ;;  %v179_v56 = vmax.f32 %v161_v51, 0.0 }
  0xdc   :  { %v546_v54 = vpop.f32.mrf.mxu0  ;;  %583 = vmatmul.mubr.f32.gmra.mxu1 %v177_v50 }
  0xdd   :  { %v178_v55 = vmax.f32 %v156_v53, 0.0  ;;  %v171_v57 = vadd.f32 %v546_v54, %v463_v37 }
  0xde   :  { %v165_v58 = vpop.f32.mrf.mxu0 }
  0xdf   :  { %v166_v59 = vadd.f32 %v463_v37, %v165_v58  ;;  %585 = vmatprep.mubr.f32.mxu1 %v178_v55  ;;  %v181_v61 = vmax.f32 %v171_v57, 0.0 }
  0xe0   :  { %586 = vmatmul.mubr.f32.gmra.mxu1 %v179_v56 }
  0xe1   :  { %v180_v60 = vmax.f32 %v166_v59, 0.0 }
  0xe3   :  { %588 = vmatprep.mubr.f32.mxu1 %v180_v60 }
  0xe4   :  { %589 = vmatmul.mubr.f32.gmra.mxu1 %v181_v61 }
 0x198   :  { %v581_v3 = vpop.f32.mrf.mxu1 }
 0x199   :  { %v279_v4 = vadd.f32 %v581_v3, %v473_v2 }
 0x19a   :  { %v273_v5 = vpop.f32.mrf.mxu1 }
 0x19b   :  { %v274_v6 = vadd.f32 %v473_v2, %v273_v5  ;;  %v313_v9 = vmax.f32 %v279_v4, 0.0 }
 0x19c   :  { %v584_v7 = vpop.f32.mrf.mxu1 }
 0x19d   :  { %v312_v8 = vmax.f32 %v274_v6, 0.0  ;;  %v289_v10 = vadd.f32 %v584_v7, %v473_v2 }
 0x19e   :  { %v283_v11 = vpop.f32.mrf.mxu1 }
 0x19f   :  { %v284_v12 = vadd.f32 %v473_v2, %v283_v11  ;;  %623 = vmatprep.mubr.f32.mxu0 %v312_v8  ;;  %v315_v15 = vmax.f32 %v289_v10, 0.0 }
 0x1a0   :  { %v587_v13 = vpop.f32.mrf.mxu1  ;;  %624 = vmatmul.mubr.f32.vlgmr.msra.gmra.mxu0 %v313_v9 }
 0x1a1   :  { %v314_v14 = vmax.f32 %v284_v12, 0.0  ;;  %v299_v16 = vadd.f32 %v587_v13, %v473_v2 }
 0x1a2   :  { %v293_v17 = vpop.f32.mrf.mxu1 }
 0x1a3   :  { %v294_v18 = vadd.f32 %v473_v2, %v293_v17  ;;  %626 = vmatprep.mubr.f32.mxu0 %v314_v14  ;;  %v317_v21 = vmax.f32 %v299_v16, 0.0 }
 0x1a4   :  { %v590_v19 = vpop.f32.mrf.mxu1  ;;  %627 = vmatmul.mubr.f32.gmra.mxu0 %v315_v15 }
 0x1a5   :  { %v316_v20 = vmax.f32 %v294_v18, 0.0  ;;  %v309_v22 = vadd.f32 %v590_v19, %v473_v2 }
 0x1a6   :  { %v303_v23 = vpop.f32.mrf.mxu1 }
 0x1a7   :  { %v304_v24 = vadd.f32 %v473_v2, %v303_v23  ;;  %629 = vmatprep.mubr.f32.mxu0 %v316_v20  ;;  %v319_v26 = vmax.f32 %v309_v22, 0.0 }
 0x1a8   :  { %630 = vmatmul.mubr.f32.gmra.mxu0 %v317_v21 }
 0x1a9   :  { %v318_v25 = vmax.f32 %v304_v24, 0.0 }
 0x1ab   :  { %632 = vmatprep.mubr.f32.mxu0 %v318_v25 }
 0x1ac   :  { %633 = vmatmul.mubr.f32.gmra.mxu0 %v319_v26 }
 0x260   :  { %v625_v28 = vpop.f32.mrf.mxu0 }
 0x261   :  { %v417_v29 = vadd.f32 %v625_v28, %v475_v27 }
 0x262   :  { %v411_v30 = vpop.f32.mrf.mxu0 }
 0x263   :  { %451 = vst [vmem:[%s754_s3 + $0x8] sm:$0xff] %v417_v29  ;;  %v412_v31 = vadd.f32 %v475_v27, %v411_v30 }
 0x264   :  { %v628_v32 = vpop.f32.mrf.mxu0 }
 0x265   :  { %450 = vst [vmem:[%s754_s3] sm:$0xff] %v412_v31  ;;  %v427_v33 = vadd.f32 %v628_v32, %v475_v27 }
 0x266   :  { %v421_v34 = vpop.f32.mrf.mxu0 }
 0x267   :  { %453 = vst [vmem:[%s754_s3 + $0x18] sm:$0xff] %v427_v33  ;;  %v422_v35 = vadd.f32 %v475_v27, %v421_v34 }
 0x268   :  { %v631_v36 = vpop.f32.mrf.mxu0 }
 0x269   :  { %452 = vst [vmem:[%s754_s3 + $0x10] sm:$0xff] %v422_v35  ;;  %v437_v37 = vadd.f32 %v631_v36, %v475_v27 }
 0x26a   :  { %v431_v38 = vpop.f32.mrf.mxu0 }
 0x26b   :  { %455 = vst [vmem:[%s754_s3 + $0x28] sm:$0xff] %v437_v37  ;;  %v432_v39 = vadd.f32 %v475_v27, %v431_v38 }
 0x26c   :  { %v634_v40 = vpop.f32.mrf.mxu0 }
 0x26d   :  { %454 = vst [vmem:[%s754_s3 + $0x20] sm:$0xff] %v432_v39  ;;  %v447_v41 = vadd.f32 %v634_v40, %v475_v27 }
 0x26e   :  { %v441_v42 = vpop.f32.mrf.mxu0 }
 0x26f   :  { %457 = vst [vmem:[%s754_s3 + $0x38] sm:$0xff] %v447_v41  ;;  %v442_v43 = vadd.f32 %v475_v27, %v441_v42 }
 0x271   :  { %456 = vst [vmem:[%s754_s3 + $0x30] sm:$0xff] %v442_v43 }
 0x272   :  { %462 = vsyncpa [#allocation3], 1 }

</bundles_post_ra>
